<compile_context>
chip_gen: v7x
topology: tpu7x:2x2x1
jax: 0.10.0
libtpu: 0.0.40
codegen_flags: <defaults>
</compile_context>

<pallas_src>
import functools

import jax
import jax.numpy as jnp
from jax.experimental import pallas as pl
from jax.experimental.pallas import tpu as pltpu


def _focal_loss_kernel(x_ref, t_ref, *rest, gamma, n_total, tile_n, use_alpha):
    # x_ref: (tile_n, C) logits   t_ref: (tile_n, 1) int32 targets
    # optional a_ref: (1, C) f32 alpha row
    # out_ref: (1, 8, 128) f32 per-tile partial sum (lane-dense block)
    if use_alpha:
        a_ref, out_ref = rest
    else:
        (out_ref,) = rest

    i = pl.program_id(0)

    x = x_ref[...].astype(jnp.float32)                      # (tile_n, C)
    t = t_ref[...]                                          # (tile_n, 1) int32

    # Target one-hot kept as bool; gathered via select (no f32 mask pass).
    col = jax.lax.broadcasted_iota(jnp.int32, x.shape, 1)   # (tile_n, C)
    is_tgt = col == t                                       # bool (tile_n, C)

    # log P[target] in log-softmax form: no full softmax P, no log(0).
    m = jnp.max(x, axis=1, keepdims=True)                   # (tile_n, 1)
    xs = x - m                                              # (tile_n, C)
    log_sum = jnp.log(jnp.sum(jnp.exp(xs), axis=1, keepdims=True))
    x_t = jnp.sum(jnp.where(is_tgt, xs, 0.0), axis=1, keepdims=True)
    log_p = x_t - log_sum                                   # (tile_n, 1)
    probs = jnp.exp(log_p)                                  # (tile_n, 1)

    d = 1.0 - probs
    g = float(gamma)
    if g == 2.0:
        focal = d * d
    elif g == float(int(g)) and g >= 0.0:
        focal = jax.lax.integer_pow(d, int(g))
    else:
        focal = jnp.power(d, g)

    per_row = -(focal * log_p)                              # (tile_n, 1)

    if use_alpha:
        # alpha = self.alpha[targets], gathered with the same bool mask.
        a = a_ref[...].astype(jnp.float32)                  # (1, C)
        alpha = jnp.sum(jnp.where(is_tgt, a, 0.0), axis=1, keepdims=True)
        per_row = alpha * per_row

    # Zero rows that only exist in the ragged last block (only emitted when
    # the grid does not divide N evenly).
    if n_total % tile_n != 0:
        row = jax.lax.broadcasted_iota(jnp.int32, per_row.shape, 0) + i * tile_n
        per_row = jnp.where(row < n_total, per_row, 0.0)

    tile_sum = jnp.sum(per_row)                             # scalar
    out_ref[...] = jnp.full(out_ref.shape, tile_sum, dtype=jnp.float32)


def _choose_tile_n(n, c, in_itemsize, vmem_budget_bytes=30 * 1024 * 1024):
    """Pick tile rows from a conservative per-row VMEM footprint model."""
    lanes = 128
    c_pad = max(-(-c // lanes) * lanes, lanes)   # lane dim pads to 128
    per_row = (
        2 * c_pad * in_itemsize      # logits tile, double-buffered pipeline
        + 4 * c_pad * 4              # wide f32 temporaries (cast/xs/exp/select)
        + 2 * lanes * 4              # targets tile, double-buffered
        + 6 * lanes * 4              # narrow (tile_n, 1) f32 columns
    )
    t = max(8, vmem_budget_bytes // per_row)
    return (int(t) // 8) * 8


def focal_loss(inputs, targets, alpha=None, *, gamma=2.0, size_average=True,
               tile_n=None):
    """Pallas implementation of FocalLoss.forward.

    inputs : (N, C) float logits (f32 or bf16)
    targets: (N,)   int class indices
    alpha  : (C, 1) per-class scalar factor, or None (== torch.ones(C, 1))
    """
    N, C = inputs.shape
    use_alpha = alpha is not None

    if tile_n is None:
        tile_n = _choose_tile_n(N, C, jnp.dtype(inputs.dtype).itemsize)
    tile_n = int(tile_n)
    if tile_n >= N:
        tile_n = N               # single full-extent block (bypasses 8-row rule)
        num_tiles = 1
    else:
        tile_n = max(8, (tile_n // 8) * 8)
        num_tiles = -(-N // tile_n)

    t2 = targets.astype(jnp.int32).reshape(N, 1)

    kernel = functools.partial(
        _focal_loss_kernel,
        gamma=float(gamma),
        n_total=int(N),
        tile_n=int(tile_n),
        use_alpha=use_alpha,
    )

    in_specs = [
        pl.BlockSpec((tile_n, C), lambda i: (i, 0)),   # logits tile
        pl.BlockSpec((tile_n, 1), lambda i: (i, 0)),   # targets tile
    ]
    args = [inputs, t2]
    if use_alpha:
        in_specs.append(pl.BlockSpec((1, C), lambda i: (0, 0)))  # alpha row
        args.append(jnp.asarray(alpha, jnp.float32).reshape(1, C))

    partials = pl.pallas_call(
        kernel,
        out_shape=jax.ShapeDtypeStruct((num_tiles, 8, 128), jnp.float32),
        grid=(num_tiles,),
        in_specs=in_specs,
        out_specs=pl.BlockSpec((1, 8, 128), lambda i: (i, 0, 0)),
        compiler_params=pltpu.CompilerParams(
            dimension_semantics=("parallel",),        # v7x: shard tiles on 2 TCs
            vmem_limit_bytes=48 * 1024 * 1024,
        ),
    )(*args)

    total = jnp.sum(partials[:, 0, 0])
    if size_average:
        total = total / jnp.float32(N)
    return total


def focal_loss_ref(inputs, targets, alpha=None, *, gamma=2.0, size_average=True):
    """Pure-JAX reference mirroring the PyTorch module."""
    N, C = inputs.shape
    p = jax.nn.softmax(inputs.astype(jnp.float32), axis=1)
    class_mask = jax.nn.one_hot(targets, C, dtype=jnp.float32)
    probs = jnp.sum(p * class_mask, axis=1, keepdims=True)
    if alpha is None:
        a = jnp.ones((N, 1), dtype=jnp.float32)
    else:
        a = jnp.asarray(alpha, jnp.float32).reshape(-1)[targets].reshape(-1, 1)
    batch_loss = -a * jnp.power(1.0 - probs, gamma) * jnp.log(probs)
    return jnp.mean(batch_loss) if size_average else jnp.sum(batch_loss)


if __name__ == "__main__":
    key = jax.random.PRNGKey(0)
    N, C = 52, 32            # N not a multiple of tile_n -> ragged last tile
    gamma = 2.0

    k_x, k_t, k_a = jax.random.split(key, 3)
    inputs = jax.random.normal(k_x, (N, C), dtype=jnp.float32)
    targets = jax.random.randint(k_t, (N,), 0, C, dtype=jnp.int32)

    # 1) default alpha (None == torch.ones(C, 1)), mean reduction,
    #    explicit small tile -> multi-tile grid with a ragged boundary block.
    loss = focal_loss(inputs, targets, None, gamma=gamma,
                      size_average=True, tile_n=16)
    loss = jax.block_until_ready(loss)
    ref = focal_loss_ref(inputs, targets, None, gamma=gamma, size_average=True)
    assert jnp.allclose(loss, ref, rtol=1e-5, atol=1e-5), (loss, ref)

    # 2) explicit non-uniform alpha, sum reduction, auto tile (single block).
    alpha = jax.random.uniform(k_a, (C, 1), minval=0.25, maxval=1.0,
                               dtype=jnp.float32)
    loss_s = focal_loss(inputs, targets, alpha, gamma=gamma,
                        size_average=False)
    loss_s = jax.block_until_ready(loss_s)
    ref_s = focal_loss_ref(inputs, targets, alpha, gamma=gamma,
                           size_average=False)
    assert jnp.allclose(loss_s, ref_s, rtol=1e-5, atol=1e-5), (loss_s, ref_s)

    print("KERNEL_OK")
</pallas_src>

<mosaic_0001>
module attributes {stable_mosaic.version = 11 : i64} {
  func.func @_focal_loss_kernel(%arg0: i32, %arg1: memref<16x32xf32, #tpu.memory_space<vmem>>, %arg2: memref<16x1xi32, #tpu.memory_space<vmem>>, %arg3: memref<1x8x128xf32, #tpu.memory_space<vmem>>) attributes {dimension_semantics = [#tpu.dimension_semantics<parallel>], iteration_bounds = array<i64: 4>, scalar_prefetch = 0 : i64, scratch_operands = 0 : i64, tpu.core_type = #tpu.core_type<tc>, window_params = [{transform_indices = @transform_0, window_bounds = array<i64: 16, 32>}, {transform_indices = @transform_1, window_bounds = array<i64: 16, 1>}, {transform_indices = @transform_2, window_bounds = array<i64: 1, 8, 128>}]} {
    %c0 = arith.constant 0 : index
    %c0_0 = arith.constant 0 : index
    %0 = vector.load %arg1[%c0, %c0_0] : memref<16x32xf32, #tpu.memory_space<vmem>>, vector<16x32xf32>
    %c0_1 = arith.constant 0 : index
    %c0_2 = arith.constant 0 : index
    %1 = vector.load %arg2[%c0_1, %c0_2] : memref<16x1xi32, #tpu.memory_space<vmem>>, vector<16x1xi32>
    %2 = tpu.iota {dimensions = array<i32: 1>} : vector<16x32xi32>
    %3 = vector.broadcast %1 : vector<16x1xi32> to vector<16x32xi32>
    %4 = arith.cmpi eq, %2, %3 : vector<16x32xi32>
    %cst = arith.constant dense<0xFF800000> : vector<16xf32>
    %5 = vector.multi_reduction <maximumf>, %0, %cst [1] : vector<16x32xf32> to vector<16xf32>
    %6 = vector.shape_cast %5 : vector<16xf32> to vector<16x1xf32>
    %7 = vector.broadcast %6 : vector<16x1xf32> to vector<16x32xf32>
    %8 = arith.subf %0, %7 : vector<16x32xf32>
    %9 = math.exp %8 : vector<16x32xf32>
    %cst_3 = arith.constant dense<0.000000e+00> : vector<16xf32>
    %10 = vector.multi_reduction <add>, %9, %cst_3 [1] : vector<16x32xf32> to vector<16xf32>
    %11 = vector.shape_cast %10 : vector<16xf32> to vector<16x1xf32>
    %12 = math.log %11 : vector<16x1xf32>
    %cst_4 = arith.constant 0.000000e+00 : f32
    %13 = vector.broadcast %cst_4 : f32 to vector<16x32xf32>
    %14 = arith.select %4, %8, %13 : vector<16x32xi1>, vector<16x32xf32>
    %cst_5 = arith.constant dense<0.000000e+00> : vector<16xf32>
    %15 = vector.multi_reduction <add>, %14, %cst_5 [1] : vector<16x32xf32> to vector<16xf32>
    %16 = vector.shape_cast %15 : vector<16xf32> to vector<16x1xf32>
    %17 = arith.subf %16, %12 : vector<16x1xf32>
    %18 = math.exp %17 : vector<16x1xf32>
    %cst_6 = arith.constant 1.000000e+00 : f32
    %19 = vector.broadcast %cst_6 : f32 to vector<16x1xf32>
    %20 = arith.subf %19, %18 : vector<16x1xf32>
    %21 = arith.mulf %20, %20 : vector<16x1xf32>
    %22 = arith.mulf %21, %17 : vector<16x1xf32>
    %cst_7 = arith.constant 0.000000e+00 : f32
    %23 = vector.broadcast %cst_7 : f32 to vector<16x1xf32>
    %24 = arith.subf %23, %22 : vector<16x1xf32>
    %25 = tpu.iota {dimensions = array<i32: 0>} : vector<16x1xi32>
    %c16_i32 = arith.constant 16 : i32
    %26 = arith.muli %arg0, %c16_i32 : i32
    %27 = vector.broadcast %26 : i32 to vector<16x1xi32>
    %28 = arith.addi %25, %27 : vector<16x1xi32>
    %c52_i32 = arith.constant 52 : i32
    %29 = vector.broadcast %c52_i32 : i32 to vector<16x1xi32>
    %30 = arith.cmpi slt, %28, %29 : vector<16x1xi32>
    %cst_8 = arith.constant 0.000000e+00 : f32
    %31 = vector.broadcast %cst_8 : f32 to vector<16x1xf32>
    %32 = arith.select %30, %24, %31 : vector<16x1xi1>, vector<16x1xf32>
    %33 = vector.shape_cast %32 : vector<16x1xf32> to vector<1x16x1xf32>
    %cst_9 = arith.constant dense<0.000000e+00> : vector<1xf32>
    %34 = vector.multi_reduction <add>, %33, %cst_9 [1, 2] : vector<1x16x1xf32> to vector<1xf32>
    %35 = vector.shape_cast %34 : vector<1xf32> to vector<1x1x1xf32>
    %36 = vector.extract %35[0, 0, 0] : f32 from vector<1x1x1xf32>
    %37 = vector.broadcast %36 : f32 to vector<1x8x128xf32>
    %c0_10 = arith.constant 0 : index
    %c0_11 = arith.constant 0 : index
    %c0_12 = arith.constant 0 : index
    %38 = vector.load %arg3[%c0_10, %c0_11, %c0_12] : memref<1x8x128xf32, #tpu.memory_space<vmem>>, vector<1x8x128xf32>
    tpu.vector_store %arg3[%c0_10, %c0_11, %c0_12], %37 {strides = array<i32>} : memref<1x8x128xf32, #tpu.memory_space<vmem>>, vector<1x8x128xf32>,
    return
  }
  func.func @transform_0(%arg0: i32) -> (i32, i32) {
    %c0_i32 = arith.constant 0 : i32
    %c0_i32_0 = arith.constant 0 : i32
    return %arg0, %c0_i32 : i32, i32
  }
  func.func @transform_1(%arg0: i32) -> (i32, i32) {
    %c0_i32 = arith.constant 0 : i32
    %c0_i32_0 = arith.constant 0 : i32
    return %arg0, %c0_i32 : i32, i32
  }
  func.func @transform_2(%arg0: i32) -> (i32, i32, i32) {
    %c0_i32 = arith.constant 0 : i32
    %c0_i32_0 = arith.constant 0 : i32
    %c0_i32_1 = arith.constant 0 : i32
    return %arg0, %c0_i32, %c0_i32_0 : i32, i32, i32
  }
}

</mosaic_0001>

<bundles_post_ra>
// kernel: tpu_custom_call.1
= control target key start
LH: loop header
LB: loop body
LE: loop exit
PB: predicated region body
PF: predicated region fallthrough
CT: control target
= control target key end

     0   :  { %7 = vsyncpa [#allocation3], 0  ;;  %s636_s0 = inlined_call_operand.vmem [shape: f32[52,32], index: 0, kind: input, shape index: {}]   ;;  %s637_s1 = inlined_call_operand.vmem [shape: s32[52,1], index: 1, kind: input, shape index: {}]   ;;  %s638_s2 = inlined_call_operand.hbm [shape: f32[4,8,128], index: 2, kind: output, shape index: {}]  }
   0x1   :  { %9 = vsyncpa [#allocation3 + $0x1], 0  ;;  %s527_s9 = smov 0   ;;  %s529_s10 = smov 0  }
   0x2   :  { %s531_s11 = smov 0   ;;  %s533_s12 = smov 0  }
   0x3 LB: > { %s548_s13 = sadd.s32 4294967295, %s508_s12   ;;  %s376_s14 = sadd.s32 4294967294, %s508_s12   ;;  %s508_s12 = sphi %s533_s12, %s644_s12   ;;  %s504_s11 = sphi %s531_s11, %s643_s11   ;;  %s500_s10 = sphi %s529_s10, %s642_s10   ;;  %s496_s9 = sphi %s527_s9, %s641_s9  }
   0x4   : > { %s552_s15 = sadd.s32 1, %s508_s12   ;;  %s74_s16 = sadd.s32 1, %s504_s11 }
   0x5   : > { %s71_s17 = ssub.s32 %s508_s12, %s552_s15  ;;  %p84_p0 = scmp.ne.s32.totalorder %s504_s11, %s500_s10 }
   0x6   : > { %p72_p1 = scmp.eq.s32.totalorder %s71_s17, 0  ;;  %p85_p2 = scmp.eq.s32.totalorder %s548_s13, 3 }
   0x7   : > { %p90_p3 = scmp.ne.s32.totalorder %s500_s10, %s496_s9  ;;  %p91_p4 = scmp.eq.s32.totalorder %s376_s14, 3 }
   0x8   : > { %s563_s18 = scalar_select %p72_p1, %s504_s11, %s74_s16  }
   0x9   : > { %p565_p5 = por %p85_p2, %p84_p0  ;;  %p569_p6 = por %p91_p4, %p90_p3 }
   0xa   : > { %p379_p7 = scmp.ge.s32.totalorder %s508_s12, 1  ;;  %p143_p8 = scmp.lt.s32.totalorder %s508_s12, 5 }
   0xc   : > { %p144_p9 = pnand %p379_p7, %p143_p8 }
   0xd   : > { %s381_s21 = sshll.u32 (!%p144_p9), %s548_s13, 1  ;;  %v510_v0 = vmov (!%p144_p9), 0   ;;  %vm220_vm0 = vcmask (!%p144_p9), 261120   ;;  %v210_v12 = vlaneseq (!%p144_p9)  ;;  %s385_s29 = sshll.u32 (!%p144_p9), %s548_s13, 4  ;;  %vm276_vm5 = vcmask (!%p144_p9), 7168  }
   0xe   : > { %147 = sbr.rel (%p144_p9) target bundleno = 589 (0x24d), region = 28  ;;  %p183_p10 = scmp.lt.s32.totalorder (!%p144_p9), %s381_s21, 6  ;;  %432 = vset.pattern.permute.xlu1 (!%p144_p9), %v510_v0  ;;  %433 = vset.pattern.permute.xlu0 (!%p144_p9), %v510_v0  ;;  %v269_v40 = vstv (!%p144_p9), %s385_s29 }
   0xf   : > { %v211_v15 = vand.u32 (!%p144_p9), 127, %v210_v12  ;;  %v266_v38 = vshrl.u32 (!%p144_p9), %v210_v12, 7  ;;  %s175_s30 = sand.u32 (!%p144_p9), 1, %s500_s10   ;;  %s387_s6 = sshll.u32 (!%p144_p9), %s548_s13, 7 }
  0x10   : > { %s380_s3 = sshll.u32 (!%p144_p9), %s175_s30, 3  ;;  %s596_s16 = scalar_lea.hbm (!%p144_p9), %s638_s2, %s387_s6 }
  0x11   : > { %v267_v41 = vadd.s32 (!%p144_p9), 8, %v266_v38  ;;  %v270_v44 = vadd.s32 (!%p144_p9), %v269_v40, %v266_v38  ;;  %s177_s4 = scalar_lea.vmem (!%p144_p9), [#allocation2], %s380_s3  ;;  %s292_s17 = scalar_lea.sflag (!%p144_p9), [#allocation3], %s175_s30 }
  0x12   : > { %s305_s5 = sshll.u32 (!%p144_p9), %s177_s4, 4  ;;  %s511_s13 = smov (!%p144_p9), [#allocation2]   ;;  %s591_s5 = int_to_ptr.vmem [resolvable:$true] %s305_s5 }
  0x13   : > { %v271_v47 = vadd.s32 (!%p144_p9), %v269_v40, %v267_v41  ;;  %vm272_vm3 = vcmp.lt.s32.totalorder (!%p144_p9), %v270_v44, 52 }
  0x15   : > { %s646_s21 = smov (!%p183_p10, %s381_s21), 6  ;;  %vm273_vm4 = vcmp.lt.s32.totalorder %v271_v47, 52 }
  0x16   : > { %s382_s22 = sshll.u32 %s646_s21, 3  ;;  %s446_s21 = scalar_lea.vmem %s591_s5, 128 }
  0x17   : > { %s186_s25 = scalar_lea.vmem %s636_s0, %s382_s22  ;;  %s200_s28 = scalar_lea.vmem %s637_s1, %s382_s22 }
  0x18   : > { %v206_v1 = vld [vmem:[%s186_s25] sm:$0xff]  ;;  %v207_v2 = vld [vmem:[%s186_s25 + $0x8] sm:$0xff]  ;;  %p447_p11 = scmp.ne.s32.totalorder %s591_s5, %s446_s21  ;;  %s450_s22 = sshll.u32 %s511_s13, 4  ;;  %s451_s22 = int_to_ptr.vmem [resolvable:$false] %s450_s22 }
  0x19   : > { %v208_v3 = vld [vmem:[%s200_s28] sm:$0xff]  ;;  %v221_v4 = vsel %vm220_vm0, %v206_v1, -inf  ;;  %v209_v5 = vld [vmem:[%s200_s28 + $0x8] sm:$0xff]  ;;  %v224_v6 = vsel %vm220_vm0, %v207_v2, -inf  ;;  %s452_s23 = scalar_lea.vmem %s451_s22, 256  ;;  %p453_p0 = scmp.lt.s32.totalorder %s591_s5, %s451_s22 }
  0x1a   : > { %213 = vperm.xlu1 %432, %v208_v3   ;;  %222 = vmax.xlane.f32.xlu0 %v221_v4  ;;  %p448_p12 = pnand %p447_p11, %p565_p5  ;;  %p454_p1 = scmp.lt.s32.totalorder %s452_s23, %s446_s21 }
  0x1c   : > { %p449_p13 = pneg %p448_p12  ;;  %p455_p2 = por %p454_p1, %p453_p0 }
  0x1e   : > { %216 = vperm.xlu1 %432, %v209_v5   ;;  %225 = vmax.xlane.f32.xlu0 %v224_v6  ;;  %p456_p3 = pnand %p455_p2, %p449_p13 }
  0x99   : > { %v214_v14 = vpop.permute.xlu1 %213 }
  0x9a   : > { %vm218_vm1 = vcmp.eq.s32.totalorder %v211_v15, %v214_v14 }
  0x9d   : > { %v217_v17 = vpop.permute.xlu1 %216 }
  0x9e   : > { %vm219_vm2 = vcmp.eq.s32.totalorder %v211_v15, %v217_v17 }
  0xa7   : > { %v223_v7 = vpop.xlane.xlu0 %222 }
  0xa8   : > { %v227_v8 = vsub.f32 %v206_v1, %v223_v7 }
  0xaa   : > { %v229_v9 = vmul.f32 1.442695, %v227_v8  ;;  %v243_v19 = vsel %vm218_vm1, %v227_v8, 0.0 }
  0xab   : > { %v226_v10 = vpop.xlane.xlu0 %225  ;;  %v245_v21 = vsel %vm220_vm0, %v243_v19, 0.0 }
  0xac   : > { %434 = vpow2.f32 %v229_v9  ;;  %v228_v11 = vsub.f32 %v207_v2, %v226_v10 }
  0xae   : > { %v231_v13 = vmul.f32 1.442695, %v228_v11  ;;  %v244_v23 = vsel %vm219_vm2, %v228_v11, 0.0 }
  0xaf   : > { %v248_v24 = vsel %vm220_vm0, %v244_v23, 0.0 }
  0xb0   : > { %436 = vpow2.f32 %v231_v13 }
  0xb6   : > { %v435_v16 = vpop.eup %434 }
  0xb7   : > { %v233_v18 = vsel %vm220_vm0, %v435_v16, 0.0 }
  0xb8   : > { %234 = vadd.xlane.f32.xlu0 %v233_v18 }
  0xba   : > { %v437_v20 = vpop.eup %436 }
  0xbb   : > { %v236_v22 = vsel %vm220_vm0, %v437_v20, 0.0 }
  0xbc   : > { %246 = vadd.xlane.f32.xlu0 %v245_v21  ;;  %237 = vadd.xlane.f32.xlu1 %v236_v22 }
  0xc0   : > { %249 = vadd.xlane.f32.xlu0 %v248_v24 }
 0x145   : > { %v235_v25 = vpop.xlane.xlu0 %234 }
 0x146   : > { %438 = vlog2.f32 %v235_v25 }
 0x149   : > { %v238_v26 = vpop.xlane.xlu1 %237  ;;  %v247_v28 = vpop.xlane.xlu0 %246 }
 0x14a   : > { %440 = vlog2.f32 %v238_v26 }
 0x14d   : > { %v250_v34 = vpop.xlane.xlu0 %249 }
 0x150   : > { %v439_v27 = vpop.eup %438 }
 0x151   : > { %v240_v29 = vmul.f32 0.6931472, %v439_v27 }
 0x153   : > { %v251_v30 = vsub.f32 %v247_v28, %v240_v29 }
 0x154   : > { %v441_v31 = vpop.eup %440 }
 0x155   : > { %v253_v32 = vmul.f32 1.442695, %v251_v30  ;;  %v242_v33 = vmul.f32 0.6931472, %v441_v31 }
 0x157   : > { %442 = vpow2.f32 %v253_v32  ;;  %v252_v35 = vsub.f32 %v250_v34, %v242_v33 }
 0x159   : > { %v255_v36 = vmul.f32 1.442695, %v252_v35 }
 0x15b   : > { %444 = vpow2.f32 %v255_v36 }
 0x161   : > { %v443_v37 = vpop.eup %442 }
 0x162   : > { %v257_v39 = vsub.f32 1.0, %v443_v37 }
 0x164   : > { %v259_v42 = vmul.f32 %v257_v39, %v257_v39 }
 0x165   : > { %v445_v43 = vpop.eup %444 }
 0x166   : > { %v261_v45 = vmul.f32 %v259_v42, %v251_v30  ;;  %v258_v46 = vsub.f32 1.0, %v445_v43 }
 0x168   : > { %v263_v48 = vsub.f32 0.0, %v261_v45  ;;  %v260_v49 = vmul.f32 %v258_v46, %v258_v46 }
 0x16a   : > { %v262_v50 = vmul.f32 %v260_v49, %v252_v35  ;;  %v274_v52 = vsel %vm272_vm3, %v263_v48, 0.0 }
 0x16b   : > { %v277_v54 = vsel %vm276_vm5, %v274_v52, 0.0 }
 0x16c   : > { %v264_v51 = vsub.f32 0.0, %v262_v50 }
 0x16e   : > { %v275_v53 = vsel %vm273_vm4, %v264_v51, 0.0 }
 0x16f   : > { %v278_v55 = vsel %vm276_vm5, %v275_v53, 0.0 }
 0x170   : > { %v279_v56 = vadd.f32 %v278_v55, %v277_v54 }
 0x172   : > { %280 = vadd.xlane.f32.xlu0 %v279_v56 }
 0x1ff   : > { %v281_v57 = vpop.xlane.xlu0 %280 }
 0x200   : > { %v282_v58 = vrot.slane %v281_v57, 4 }
 0x202   : > { %v283_v59 = vadd.f32 %v282_v58, %v281_v57 }
 0x204   : > { %v284_v60 = vrot.slane %v283_v59, 2 }
 0x206   : > { %v285_v61 = vadd.f32 %v284_v60, %v283_v59 }
 0x208   : > { %v286_v62 = vrot.slane %v285_v61, 1 }
 0x20a   : > { %v287_v63 = vadd.f32 %v286_v62, %v285_v61 }
 0x20c   : > { %390 = vpush %v287_v63 }
 0x23d   : > { %s391_s7 = spop %390 }
 0x23e   : > { %v289_v0 = vstv %s391_s7 }
 0x23f   : > { %290 = vst [vmem:[%s177_s4] sm:$0xff] %v289_v0 }
 0x240   : > { %459 = shalt.err (!%p456_p3)
}
 0x241   : > { %s460_s24 = scalar_lea.hbm %s596_s16, 128  ;;  %s464_s27 = scalar_lea.hbm %s638_s2, 512 }
 0x242   : > { %p461_p4 = scmp.ne.s32.totalorder %s596_s16, %s460_s24  ;;  %p465_p9 = scmp.lt.u32.totalorder %s596_s16, %s638_s2 }
 0x243   : > { %p466_p10 = scmp.lt.u32.totalorder %s464_s27, %s460_s24  ;;  %p468_p12 = scmp.lt.u32.totalorder %s460_s24, %s596_s16 }
 0x244   : > { %p462_p7 = pnand %p461_p4, %p565_p5 }
 0x245   : > { %p467_p11 = por %p466_p10, %p465_p9 }
 0x246   : > { %p463_p8 = pneg %p462_p7 }
 0x247   : > { %p469_p13 = por %p468_p12, %p467_p11 }
 0x249   : > { %p470_p0 = pnand %p469_p13, %p463_p8 }
 0x24b   : > { %473 = shalt.err (!%p470_p0)
}
 0x24c   : > { %392 = dma.vmem_to_hbm [thread:$0]  (%p565_p5), %s591_s5, 128, %s596_s16, %s292_s17  }
 0x24d PF: > { %p398_p1 = scmp.ge.s32.totalorder %s508_s12, 2  ;;  %s317_s30 = sand.u32 1, %s496_s9  }
 0x24e   : > { %s318_s3 = scalar_lea.sflag [#allocation3], %s317_s30 }
 0x24f   : > { %p395_p2 = pnand %p398_p1, %p569_p6 }
 0x251   : > { %491 = dma.done.wait (!%p395_p2), %s318_s3, 128  }
 0x252   : > { %493 = vsyncadd (!%p395_p2), %s318_s3, 4294967168  ;;  %p12_p3 = scmp.ge.s32.totalorder %s552_s15, 6   ;;  %s641_s9 = smov %s500_s10 }
 0x253   : > { %s642_s10 = smov %s504_s11  ;;  %s643_s11 = smov %s563_s18 }
 0x254   : > { %s644_s12 = smov %s552_s15  ;;  %14 = sbr.rel (!%p12_p3) target bundleno = 3 (0x3), region = 66 }
 0x25b   :  { %323 = vsyncpa [#allocation3], 1 }
 0x25c   :  { %325 = vsyncpa [#allocation3 + $0x1], 1 }

</bundles_post_ra>
